<compile_context>
chip_gen: v6e
topology: v6e:2x2x1
jax: 0.10.0
libtpu: 0.0.40
codegen_flags: <defaults>
</compile_context>

<pallas_src>
import functools
import math

import jax
import jax.numpy as jnp
from jax.experimental import pallas as pl
from jax.experimental.pallas import tpu as pltpu


def _make_divisible(v, divisor=8, min_value=None):
    min_value = min_value or divisor
    new_v = max(min_value, int(v + divisor / 2) // divisor * divisor)
    if new_v < 0.9 * v:
        new_v += divisor
    return new_v


def edge_residual_kernel(p_ref, w1_ref, b1_ref, w2_ref, b2_ref, o_ref,
                         *, Cin, center_row, has_residual):
    """One (batch image, pixel tile) block per grid step.

    Orientation: channels on sublanes, pixels on lanes (NCHW-native).
      p_ref  : (1, K*K*Cin, TP) bf16   im2col patches (pixels = lanes)
      w1_ref : (Cmid, K*K*Cin)  bf16   3x3 expansion weights, BN1 scale folded
      b1_ref : (Cmid, 1)        f32    BN1 bias
      w2_ref : (Cout, Cmid)     f32    1x1 pwl weights, BN2 scale folded
      b2_ref : (Cout, 1)        f32    BN2 bias
      o_ref  : (1, Cout, TP)    f32    NCHW-flat output tile
    """
    p = p_ref[0]                                              # (KKC, TP) bf16

    # conv_exp + bn1 scale: one MXU contraction over K*K*Cin, 256-wide output.
    acc = jnp.dot(w1_ref[...], p,
                  preferred_element_type=jnp.float32)          # (Cmid, TP) f32

    # bn1 bias + ReLU in f32 (SE is Identity for se_ratio=0.0).
    h = jnp.maximum(acc + b1_ref[...], 0.0)

    # conv_pwl (1x1) + bn2 scale: tiny f32 matmul (accuracy headroom, cheap).
    y = jnp.dot(w2_ref[...], h,
                preferred_element_type=jnp.float32)            # (Cout, TP) f32
    y = y + b2_ref[...]

    # Residual = centre im2col tap (kh=kw=K//2): no extra input stream / DMA.
    if has_residual:
        y = y + p[center_row:center_row + Cin, :].astype(jnp.float32)

    o_ref[0] = y.astype(o_ref.dtype)


def edge_residual_pallas(x_nchw, w_exp_oihw, w_pwl_oihw, bn1, bn2,
                         *, kernel_size=3, stride=1, noskip=False, eps=1e-5,
                         core_parallel_batch=False):
    assert stride == 1, "default EdgeResidual config uses stride=1"
    # TODO(synk): stride>1 pointwise-linear conv (spatial subsampling) not implemented.

    N, Cin, H, W = x_nchw.shape
    Cmid = w_exp_oihw.shape[0]
    Cout = w_pwl_oihw.shape[0]
    K = kernel_size
    KKC = K * K * Cin
    HW = H * W
    has_residual = (Cin == Cout) and (stride == 1) and (not noskip)
    pad = (stride - 1 + (K - 1)) // 2          # static 'same' padding ('' pad_type)

    # ---- wrapper-side im2col, NCHW-native (no NHWC relayout) ---------------
    xb = x_nchw.astype(jnp.bfloat16)
    xp = jnp.pad(xb, ((0, 0), (0, 0), (pad, pad), (pad, pad)))
    taps = [xp[:, :, kh:kh + H, kw:kw + W]
            for kh in range(K) for kw in range(K)]             # each (N,Cin,H,W)
    patches = jnp.concatenate(taps, axis=1).reshape(N, KKC, HW)   # bf16
    # TODO(synk): at large H*W, fetch a (rows+2) halo tile per step and form the
    # 9 taps in-kernel to avoid the 9x im2col HBM read blow-up (review #7).

    # ---- fold BN scales into the conv weights (per-channel bias remains) ---
    def fold(gamma, beta, mean, var):
        s = gamma / jnp.sqrt(var + eps)
        return s, beta - mean * s

    s1, b1 = fold(*bn1)
    s2, b2 = fold(*bn2)
    # (Cmid, K*K*Cin), row order (kh, kw, cin) matching the patch rows.
    w1 = (jnp.transpose(w_exp_oihw, (0, 2, 3, 1)).reshape(Cmid, KKC)
          * s1[:, None]).astype(jnp.bfloat16)
    # (Cout, Cmid) kept f32: the second matmul is tiny and not MXU-bound.
    w2 = (w_pwl_oihw[:, :, 0, 0] * s2[:, None]).astype(jnp.float32)
    b1 = b1.reshape(Cmid, 1).astype(jnp.float32)
    b2 = b2.reshape(Cout, 1).astype(jnp.float32)

    # ---- pixel tile from a VMEM budget (double-buffered streaming tiles) ---
    TILE_BUDGET = 8 << 20          # conservative across v5e/v6e/v7x scoped VMEM

    def per_step_bytes(tp):
        return 2 * (KKC * tp * 2) + 2 * (Cout * tp * 4)

    TP = HW                        # whole image per step when it fits (it does here)
    if HW % 128 == 0:
        while per_step_bytes(TP) > TILE_BUDGET and TP % 256 == 0:
            TP //= 2               # stays a multiple of 128 and a divisor of HW
    n_ptiles = HW // TP

    in_specs = [
        pl.BlockSpec((1, KKC, TP), lambda n, t: (n, 0, t)),
        pl.BlockSpec((Cmid, KKC), lambda n, t: (0, 0)),
        pl.BlockSpec((Cmid, 1), lambda n, t: (0, 0)),
        pl.BlockSpec((Cout, Cmid), lambda n, t: (0, 0)),
        pl.BlockSpec((Cout, 1), lambda n, t: (0, 0)),
    ]
    out_spec = pl.BlockSpec((1, Cout, TP), lambda n, t: (n, 0, t))

    kernel = functools.partial(
        edge_residual_kernel,
        Cin=Cin,
        center_row=((K // 2) * K + (K // 2)) * Cin,
        has_residual=has_residual)

    # Enable core_parallel_batch on v7x (2 TCs/chip) to split images across
    # cores; plain PARALLEL keeps the lowering portable to v5e/v6e (1 TC).
    batch_sem = pltpu.CORE_PARALLEL if core_parallel_batch else pltpu.PARALLEL

    out_flat = pl.pallas_call(
        kernel,
        out_shape=jax.ShapeDtypeStruct((N, Cout, HW), jnp.float32),
        grid_spec=pltpu.PrefetchScalarGridSpec(
            num_scalar_prefetch=0,
            grid=(N, n_ptiles),
            in_specs=in_specs,
            out_specs=out_spec,
        ),
        compiler_params=pltpu.CompilerParams(
            dimension_semantics=(batch_sem, pltpu.PARALLEL),
            vmem_limit_bytes=32 * 1024 * 1024,
        ),
    )(patches, w1, b1, w2, b2)

    # Output is already NCHW-flat: pure reshape, no transpose.
    return out_flat.reshape(N, Cout, H, W)


# ---------------------------- pure-JAX reference ----------------------------
def edge_residual_ref(x_nchw, w_exp_oihw, w_pwl_oihw, bn1, bn2,
                      *, stride=1, noskip=False, eps=1e-5):
    def bn(y, gamma, beta, mean, var):
        sc = (gamma / jnp.sqrt(var + eps))[None, :, None, None]
        bi = (beta - mean * gamma / jnp.sqrt(var + eps))[None, :, None, None]
        return y * sc + bi

    dn = ("NCHW", "OIHW", "NCHW")
    K = w_exp_oihw.shape[-1]
    pad = (K - 1) // 2
    y = jax.lax.conv_general_dilated(x_nchw, w_exp_oihw, (1, 1),
                                     [(pad, pad), (pad, pad)],
                                     dimension_numbers=dn)
    y = jnp.maximum(bn(y, *bn1), 0.0)
    y = jax.lax.conv_general_dilated(y, w_pwl_oihw, (stride, stride),
                                     [(0, 0), (0, 0)], dimension_numbers=dn)
    y = bn(y, *bn2)
    if x_nchw.shape[1] == y.shape[1] and stride == 1 and not noskip:
        y = y + x_nchw
    return y


if __name__ == "__main__":
    # Module config: in=8, out=8, k=3, stride=1, exp_ratio=4.0 -> mid=32
    in_ch, out_ch, kernel_size, stride, exp_ratio = 8, 8, 3, 1, 4.0
    mid_ch = _make_divisible(in_ch * exp_ratio)  # 32
    N, H, W = 2, 16, 16

    key = jax.random.PRNGKey(0)
    ks = jax.random.split(key, 10)

    x = jax.random.normal(ks[0], (N, in_ch, H, W), jnp.float32)

    # conv weights (PyTorch OIHW layout), bias=False for both convs
    fan1 = in_ch * kernel_size * kernel_size
    w_exp = jax.random.normal(ks[1], (mid_ch, in_ch, kernel_size, kernel_size),
                              jnp.float32) * (1.0 / math.sqrt(fan1))
    w_pwl = jax.random.normal(ks[2], (out_ch, mid_ch, 1, 1),
                              jnp.float32) * (1.0 / math.sqrt(mid_ch))

    # BatchNorm params (inference form: gamma, beta, running_mean, running_var)
    bn1 = (1.0 + 0.1 * jax.random.normal(ks[3], (mid_ch,), jnp.float32),
           0.1 * jax.random.normal(ks[4], (mid_ch,), jnp.float32),
           0.1 * jax.random.normal(ks[5], (mid_ch,), jnp.float32),
           jnp.abs(jax.random.normal(ks[6], (mid_ch,), jnp.float32)) + 0.5)
    bn2 = (1.0 + 0.1 * jax.random.normal(ks[7], (out_ch,), jnp.float32),
           0.1 * jax.random.normal(ks[8], (out_ch,), jnp.float32),
           0.1 * jax.random.normal(ks[9], (out_ch,), jnp.float32),
           jnp.abs(jax.random.normal(ks[0], (out_ch,), jnp.float32)) + 0.5)

    out = edge_residual_pallas(x, w_exp, w_pwl, bn1, bn2,
                               kernel_size=kernel_size, stride=stride)
    out = jax.block_until_ready(out)

    ref = edge_residual_ref(x, w_exp, w_pwl, bn1, bn2, stride=stride)
    assert out.shape == (N, out_ch, H, W)
    # bf16 MXU inputs / bf16 centre-tap residual (f32 accumulation, f32 second
    # matmul) -> looser tolerance vs the pure-f32 reference.
    max_err = jnp.max(jnp.abs(out - ref))
    assert jnp.allclose(out, ref, atol=5e-2, rtol=5e-2), f"max abs err {max_err}"

    print("KERNEL_OK")
</pallas_src>

<mosaic_0001>
module attributes {stable_mosaic.version = 11 : i64} {
  func.func @edge_residual_kernel(%arg0: i32, %arg1: i32, %arg2: memref<1x72x256xbf16, #tpu.memory_space<vmem>>, %arg3: memref<32x72xbf16, #tpu.memory_space<vmem>>, %arg4: memref<32x1xf32, #tpu.memory_space<vmem>>, %arg5: memref<8x32xf32, #tpu.memory_space<vmem>>, %arg6: memref<8x1xf32, #tpu.memory_space<vmem>>, %arg7: memref<1x8x256xf32, #tpu.memory_space<vmem>>) attributes {dimension_semantics = [#tpu.dimension_semantics<parallel>, #tpu.dimension_semantics<parallel>], iteration_bounds = array<i64: 2, 1>, scalar_prefetch = 0 : i64, scratch_operands = 0 : i64, tpu.core_type = #tpu.core_type<tc>, window_params = [{transform_indices = @transform_0, window_bounds = array<i64: 1, 72, 256>}, {pipeline_mode = #tpu.pipeline_mode<synchronous>, transform_indices = @transform_1, window_bounds = array<i64: 32, 72>}, {pipeline_mode = #tpu.pipeline_mode<synchronous>, transform_indices = @transform_2, window_bounds = array<i64: 32, 1>}, {pipeline_mode = #tpu.pipeline_mode<synchronous>, transform_indices = @transform_3, window_bounds = array<i64: 8, 32>}, {pipeline_mode = #tpu.pipeline_mode<synchronous>, transform_indices = @transform_4, window_bounds = array<i64: 8, 1>}, {transform_indices = @transform_5, window_bounds = array<i64: 1, 8, 256>}]} {
    %c0 = arith.constant 0 : index
    %c0_0 = arith.constant 0 : index
    %c0_1 = arith.constant 0 : index
    %0 = vector.load %arg2[%c0, %c0_0, %c0_1] : memref<1x72x256xbf16, #tpu.memory_space<vmem>>, vector<1x72x256xbf16>
    %1 = vector.shape_cast %0 : vector<1x72x256xbf16> to vector<72x256xbf16>
    %c0_2 = arith.constant 0 : index
    %c0_3 = arith.constant 0 : index
    %2 = vector.load %arg3[%c0_2, %c0_3] : memref<32x72xbf16, #tpu.memory_space<vmem>>, vector<32x72xbf16>
    %cst = arith.constant dense<0.000000e+00> : vector<32x256xf32>
    %3 = tpu.matmul %2, %1, %cst {dimension_numbers = #tpu.dot_dimension_numbers<[1], [0], [0], [1], [0, 0, 1, 1], [], []>} : vector<32x72xbf16>, vector<72x256xbf16>, vector<32x256xf32> -> vector<32x256xf32>
    %c0_4 = arith.constant 0 : index
    %c0_5 = arith.constant 0 : index
    %4 = vector.load %arg4[%c0_4, %c0_5] : memref<32x1xf32, #tpu.memory_space<vmem>>, vector<32x1xf32>
    %5 = vector.broadcast %4 : vector<32x1xf32> to vector<32x256xf32>
    %6 = arith.addf %3, %5 : vector<32x256xf32>
    %cst_6 = arith.constant 0.000000e+00 : f32
    %7 = vector.broadcast %cst_6 : f32 to vector<32x256xf32>
    %8 = arith.maximumf %6, %7 : vector<32x256xf32>
    %c0_7 = arith.constant 0 : index
    %c0_8 = arith.constant 0 : index
    %9 = vector.load %arg5[%c0_7, %c0_8] : memref<8x32xf32, #tpu.memory_space<vmem>>, vector<8x32xf32>
    %cst_9 = arith.constant dense<0.000000e+00> : vector<8x256xf32>
    %10 = tpu.matmul %9, %8, %cst_9 {dimension_numbers = #tpu.dot_dimension_numbers<[1], [0], [0], [1], [0, 0, 1, 1], [], []>} : vector<8x32xf32>, vector<32x256xf32>, vector<8x256xf32> -> vector<8x256xf32>
    %c0_10 = arith.constant 0 : index
    %c0_11 = arith.constant 0 : index
    %11 = vector.load %arg6[%c0_10, %c0_11] : memref<8x1xf32, #tpu.memory_space<vmem>>, vector<8x1xf32>
    %12 = vector.broadcast %11 : vector<8x1xf32> to vector<8x256xf32>
    %13 = arith.addf %10, %12 : vector<8x256xf32>
    %14 = vector.extract_strided_slice %1 {offsets = [32, 0], sizes = [8, 256], strides = [1, 1]} : vector<72x256xbf16> to vector<8x256xbf16>
    %15 = arith.extf %14 : vector<8x256xbf16> to vector<8x256xf32>
    %16 = arith.addf %13, %15 : vector<8x256xf32>
    %c0_12 = arith.constant 0 : index
    %c0_13 = arith.constant 0 : index
    %c0_14 = arith.constant 0 : index
    %17 = vector.load %arg7[%c0_12, %c0_13, %c0_14] : memref<1x8x256xf32, #tpu.memory_space<vmem>>, vector<1x8x256xf32>
    %18 = vector.shape_cast %17 : vector<1x8x256xf32> to vector<8x256xf32>
    %19 = vector.shape_cast %16 : vector<8x256xf32> to vector<1x8x256xf32>
    tpu.vector_store %arg7[%c0_12, %c0_13, %c0_14], %19 {strides = array<i32>} : memref<1x8x256xf32, #tpu.memory_space<vmem>>, vector<1x8x256xf32>,
    return
  }
  func.func @transform_0(%arg0: i32, %arg1: i32) -> (i32, i32, i32) {
    %c0_i32 = arith.constant 0 : i32
    %c0_i32_0 = arith.constant 0 : i32
    return %arg0, %c0_i32, %arg1 : i32, i32, i32
  }
  func.func @transform_1(%arg0: i32, %arg1: i32) -> (i32, i32) {
    %c0_i32 = arith.constant 0 : i32
    %c0_i32_0 = arith.constant 0 : i32
    %c0_i32_1 = arith.constant 0 : i32
    return %c0_i32, %c0_i32_0 : i32, i32
  }
  func.func @transform_2(%arg0: i32, %arg1: i32) -> (i32, i32) {
    %c0_i32 = arith.constant 0 : i32
    %c0_i32_0 = arith.constant 0 : i32
    %c0_i32_1 = arith.constant 0 : i32
    return %c0_i32, %c0_i32_0 : i32, i32
  }
  func.func @transform_3(%arg0: i32, %arg1: i32) -> (i32, i32) {
    %c0_i32 = arith.constant 0 : i32
    %c0_i32_0 = arith.constant 0 : i32
    %c0_i32_1 = arith.constant 0 : i32
    return %c0_i32, %c0_i32_0 : i32, i32
  }
  func.func @transform_4(%arg0: i32, %arg1: i32) -> (i32, i32) {
    %c0_i32 = arith.constant 0 : i32
    %c0_i32_0 = arith.constant 0 : i32
    %c0_i32_1 = arith.constant 0 : i32
    return %c0_i32, %c0_i32_0 : i32, i32
  }
  func.func @transform_5(%arg0: i32, %arg1: i32) -> (i32, i32, i32) {
    %c0_i32 = arith.constant 0 : i32
    %c0_i32_0 = arith.constant 0 : i32
    return %arg0, %c0_i32, %arg1 : i32, i32, i32
  }
}

</mosaic_0001>

<bundles_post_ra>
// kernel: tpu_custom_call.1
= control target key start
LH: loop header
LB: loop body
LE: loop exit
PB: predicated region body
PF: predicated region fallthrough
CT: control target
= control target key end

     0   :  { %10 = vsyncpa [#allocation3], 0  ;;  %s1065_s0 = inlined_call_operand.hbm [shape: bf16[2,72,256], index: 0, kind: input, shape index: {}]   ;;  %s1066_s1 = inlined_call_operand.vmem [shape: bf16[32,72], index: 1, kind: input, shape index: {}]   ;;  %s1067_s2 = inlined_call_operand.vmem [shape: f32[32,1], index: 2, kind: input, shape index: {}]   ;;  %s1068_s3 = inlined_call_operand.vmem [shape: f32[8,32], index: 3, kind: input, shape index: {}]   ;;  %s1069_s4 = inlined_call_operand.vmem [shape: f32[8,1], index: 4, kind: input, shape index: {}]   ;;  %s1070_s5 = inlined_call_operand.hbm [shape: f32[2,8,256], index: 5, kind: output, shape index: {}]  }
   0x1   :  { %12 = vsyncpa [#allocation3 + $0x1], 0 }
   0x2   :  { %13 = vsyncpa [#allocation4], 0 }
   0x3   :  { %15 = vsyncpa [#allocation4 + $0x1], 0  ;;  %s891_s18 = smov 0   ;;  %s893_s19 = smov 0  }
   0x4   :  { %s895_s20 = smov 0   ;;  %s897_s21 = smov 0  }
   0x5   :  { %s899_s22 = smov 0   ;;  %s901_s23 = smov 0  }
   0x6 LB: > { %s620_s24 = sadd.s32 4294967295, %s853_s23   ;;  %s621_s25 = sadd.s32 4294967294, %s853_s23   ;;  %s853_s23 = sphi %s901_s23, %s21_s23   ;;  %s849_s22 = sphi %s899_s22, %s1081_s22   ;;  %s845_s21 = sphi %s897_s21, %s1080_s21   ;;  %s841_s20 = sphi %s895_s20, %s1079_s20   ;;  %s837_s19 = sphi %s893_s19, %s1078_s19   ;;  %s833_s18 = sphi %s891_s18, %s1077_s18  }
   0x7   : > { %s33_s26 = sadd.s32 1, %s849_s22  ;;  %s42_s27 = sadd.s32 1, %s841_s20 }
   0x8   : > { %p35_p0 = scmp.ge.s32.totalorder %s33_s26, 2  ;;  %p49_p1 = scmp.ne.s32.totalorder %s841_s20, %s837_s19 }
   0x9   : > { %p50_p2 = scmp.eq.s32.totalorder %s853_s23, 0  ;;  %p55_p3 = scmp.ne.s32.totalorder %s837_s19, %s833_s18 }
   0xa   : > { %s1083_s26 = smov (%p35_p0, %s33_s26), 0  ;;  %p56_p5 = scmp.eq.s32.totalorder %s620_s24, 0 }
   0xb   : > { %p932_p4 = por %p50_p2, %p49_p1  ;;  %s37_s29 = ssub.s32 %s849_s22, %s1083_s26 }
   0xc   : > { %p165_p6 = scmp.eq.s32.totalorder %s620_s24, 1  ;;  %p40_p7 = scmp.eq.s32.totalorder %s37_s29, 0 }
   0xd   : > { %p938_p8 = por %p56_p5, %p55_p3  ;;  %p171_p10 = scmp.eq.s32.totalorder %s621_s25, 1 }
   0xe   : > { %p942_p9 = por %p165_p6, %p49_p1  ;;  %p674_p13 = scmp.lt.s32.totalorder %s853_s23, 2 }
   0xf   : > { %s947_s7 = scalar_select %p40_p7, %s841_s20, %s42_s27  }
  0x10   : > { %p949_p11 = por %p171_p10, %p55_p3  ;;  %s203_s9 = sand.u32 1, %s841_s20  }
  0x11   : > { %s659_s10 = smul.u32 72, %s203_s9  ;;  %p959_p0 = pnand %p674_p13, %p932_p4 }
  0x12   : > { %s660_s11 = smul.u32 1152, %s849_s22  ;;  %p625_p1 = scmp.ge.s32.totalorder %s853_s23, 1 }
  0x13   : > { %s207_s16 = scalar_lea.vmem [#allocation2], %s659_s10  ;;  %s204_s24 = scalar_lea.sflag [#allocation3], %s203_s9 }
  0x14   : > { %s215_s15 = scalar_lea.hbm %s1065_s0, %s660_s11  ;;  %s216_s17 = sshll.u32 %s207_s16, 4  ;;  %s217_s17 = int_to_ptr.vmem [resolvable:$true] %s216_s17 }
  0x15   : > { %p747_p2 = pneg %p959_p0  ;;  %s758_s25 = scalar_lea.vmem %s217_s17, 1152 }
  0x16   : > { %p759_p3 = scmp.ne.s32.totalorder %s217_s17, %s758_s25  ;;  %s855_s27 = smov [#allocation2]  }
  0x17   : > { %s763_s28 = sshll.u32 %s855_s27, 4  ;;  %s764_s28 = int_to_ptr.vmem [resolvable:$false] %s763_s28 }
  0x18   : > { %p761_p5 = pnand %p759_p3, %p747_p2  ;;  %s765_s29 = scalar_lea.vmem %s764_s28, 2304 }
  0x19   : > { %p766_p4 = scmp.lt.s32.totalorder %s217_s17, %s764_s28  ;;  %p767_p7 = scmp.lt.s32.totalorder %s765_s29, %s758_s25 }
  0x1a   : > { %p762_p6 = pneg %p761_p5 }
  0x1b   : > { %p768_p10 = por %p767_p7, %p766_p4 }
  0x1d   : > { %p769_p13 = pnand %p768_p10, %p762_p6 }
  0x1f   : > { %772 = shalt.err (!%p769_p13)
}
  0x20   : > { %s856_s10 = smov 128   ;;  %s857_s9 = smov 8  }
  0x21   : > { %669 = dma.hbm_to_vmem [thread:$0]  (!%p959_p0), %s215_s15, 1152, %s217_s17, %s204_s24, %s856_s10, %s856_s10, %s857_s9  }
  0x22   : > { %p224_p12 = scmp.lt.s32.totalorder %s853_s23, 3 }
  0x24   : > { %p225_p2 = pnand %p625_p1, %p224_p12 }
  0x25   : > { %s975_s11 = sand.u32 (!%p225_p2), 1, %s837_s19  }
  0x26   : > { %228 = sbr.rel (%p225_p2) target bundleno = 490 (0x1ea), region = 40  ;;  %s231_s14 = scalar_lea.sflag (!%p225_p2), [#allocation3], %s975_s11 }
  0x27   : > { %s661_s13 = smul.u32 (!%p225_p2), 72, %s975_s11 }
  0x29   : > { %s979_s16 = scalar_lea.vmem (!%p225_p2), [#allocation2], %s661_s13 }
  0x2b   : > { %824 = dma.done.wait (%p938_p8), %s231_s14, 1152  }
  0x2c   : > { %826 = vsyncadd (%p938_p8), %s231_s14, 4294966144  ;;  %v858_v0 = vmov 0   ;;  %v272_v1 = vld [vmem:[%s979_s16 + $0x40] sm:$0xff]  ;;  %vm363_vm0 = vcmask 1043456   ;;  %v732_v4 = vld [vmem:[%s979_s16 + $0x34] ss:$8 sps:$4 sm:$0xff]  }
  0x2d   : > { %402 = vmatprep.mubr.bf16.mxu0 %v858_v0  ;;  %412 = vmatprep.mubr.bf16.mxu1 %v858_v0  ;;  %v638_v2 = vcombine.high %v272_v1, %v272_v1  ;;  %v637_v3 = vcombine.low %v272_v1, %v272_v1  ;;  %v988_v5 = vld [vmem:[%s979_s16 + $0x20] sm:$0xff]  ;;  %v269_v6 = vld [vmem:[%s979_s16 + $0x28] sm:$0xff]  ;;  %v734_v8 = vld [vmem:[%s979_s16 + $0x30] ss:$8 sps:$4 sm:$0xff]   ;;  %vm356_vm1 = vcmask 588800   ;;  %v859_v22 = vmov 0.0  }
  0x2e   : > { %728 = vset.pattern.permute.xlu0 %v858_v0  ;;  %729 = vset.pattern.permute.xlu1 %v858_v0  ;;  %v634_v9 = vcombine.high %v988_v5, %v269_v6  ;;  %v280_v10 = vld [vmem:[%s1067_s2 + $0x18] sm:$0xff]  ;;  %v278_v11 = vld [vmem:[%s1067_s2 + $0x8] sm:$0xff]  ;;  %v633_v12 = vcombine.low %v988_v5, %v269_v6  ;;  %v279_v14 = vld [vmem:[%s1067_s2 + $0x10] sm:$0xff]  ;;  %vm438_vm2 = vcmask 261120   ;;  %s626_s15 = sshll.u32 %s975_s11, 4  ;;  %v513_v52 = vunpack.c.l.bf16 %v988_v5  ;;  %s648_s17 = sshll.u32 %s845_s21, 8 }
  0x2f   : > { %639 = vmatprep.subr.msk.bf16.mxu0 %vm363_vm0, %v638_v2  ;;  %649 = vmatprep.subr.msk.bf16.mxu1 %vm363_vm0, %v638_v2  ;;  %v365_v7 = vsel %vm363_vm0, %v637_v3, 0  ;;  %v737_v13 = vld [vmem:[%s979_s16 + $0x14] ss:$8 sps:$4 sm:$0xff]   ;;  %v739_v16 = vld [vmem:[%s979_s16 + $0x10] ss:$8 sps:$4 sm:$0xff]   ;;  %v744_v21 = vld [vmem:[%s1066_s1 + $0x8] sm:$0xff]   ;;  %v514_v56 = vunpack.c.h.bf16 %v988_v5  ;;  %s534_s29 = scalar_lea.hbm %s1070_s5, %s648_s17 }
  0x30   : > { %377 = vmatpush1.bf16.msra.mxu0 %v365_v7  ;;  %654 = vmatpush1.bf16.msra.mxu1 %v365_v7  ;;  %v277_v15 = vld [vmem:[%s1067_s2] sm:$0xff]  ;;  %s260_s24 = scalar_lea.vmem [#allocation5], %s626_s15  ;;  %s520_s10 = scalar_lea.sflag [#allocation4], %s975_s11 }
  0x31   : > { %378 = vmatprep.subr.bf16.mxu0 %v732_v4  ;;  %650 = vmatprep.subr.bf16.mxu1 %v732_v4  ;;  %v740_v17 = vld [vmem:[%s979_s16 + $0x4] ss:$8 sps:$4 sm:$0xff]   ;;  %v742_v19 = vld [vmem:[%s979_s16] ss:$8 sps:$4 sm:$0xff]   ;;  %s536_s25 = sshll.u32 %s260_s24, 4  ;;  %s860_s13 = smov [#allocation5]   ;;  %s537_s25 = int_to_ptr.vmem [resolvable:$true] %s536_s25 }
  0x32   : > { %298 = vperm.xlu0 %728, %v280_v10   ;;  %288 = vperm.xlu1 %729, %v278_v11   ;;  %v432_v18 = vld [vmem:[%s1069_s4] sm:$0xff]  ;;  %s773_s9 = scalar_lea.vmem %s537_s25, 256  ;;  %s777_s21 = sshll.u32 %s860_s13, 4  ;;  %s778_s21 = int_to_ptr.vmem [resolvable:$false] %s777_s21 }
  0x33   : > { %v743_v20 = vld [vmem:[%s1066_s1] sm:$0xff]   ;;  %p774_p8 = scmp.ne.s32.totalorder %s537_s25, %s773_s9  ;;  %s779_s14 = scalar_lea.vmem %s778_s21, 512 }
  0x34   : > { %379 = vmatpush1.bf16.msra.mxu0 %v734_v8  ;;  %655 = vmatpush1.bf16.msra.mxu1 %v734_v8  ;;  %v431_v51 = vld [vmem:[%s1068_s3] sm:$0xff]  ;;  %p780_p1 = scmp.lt.s32.totalorder %s537_s25, %s778_s21  ;;  %p781_p3 = scmp.lt.s32.totalorder %s779_s14, %s773_s9 }
  0x35   : > { %380 = vmatprep.subr.bf16.mxu0 %v634_v9  ;;  %651 = vmatprep.subr.bf16.mxu1 %v634_v9  ;;  %p775_p12 = pnand %p774_p8, %p942_p9 }
  0x36   : > { %293 = vperm.xlu0 %728, %v279_v14   ;;  %283 = vperm.xlu1 %729, %v277_v15   ;;  %p782_p5 = por %p781_p3, %p780_p1 }
  0x37   : > { %p776_p0 = pneg %p775_p12 }
  0x38   : > { %381 = vmatpush1.bf16.msra.mxu0 %v633_v12  ;;  %656 = vmatpush1.bf16.msra.mxu1 %v633_v12 }
  0x39   : > { %382 = vmatprep.subr.bf16.mxu0 %v737_v13  ;;  %652 = vmatprep.subr.bf16.mxu1 %v737_v13  ;;  %p783_p6 = pnand %p782_p5, %p776_p0 }
  0x3a   : > { %435 = vperm.xlu0 %728, %v432_v18  }
  0x3c   : > { %383 = vmatpush1.bf16.msra.mxu0 %v739_v16  ;;  %657 = vmatpush1.bf16.msra.mxu1 %v739_v16 }
  0x3d   : > { %384 = vmatprep.subr.bf16.mxu0 %v740_v17  ;;  %653 = vmatprep.subr.bf16.mxu1 %v740_v17 }
  0x40   : > { %385 = vmatpush1.bf16.msra.mxu0 %v742_v19  ;;  %658 = vmatpush1.bf16.msra.mxu1 %v742_v19 }
  0x43   : > { %640 = vmatmul.mubr.msk.bf16.vlgmr.msra.gmra.mxu0 %vm356_vm1, %v743_v20  ;;  %641 = vmatmul.mubr.msk.bf16.vlgmr.msra.gmra.mxu1 %vm356_vm1, %v744_v21 }
  0x44   : > { %506 = vmatprep.mubr.f32.mxu1 %v859_v22 }
  0xad   : > { %v299_v23 = vpop.permute.xlu0 %298  ;;  %v289_v26 = vpop.permute.xlu1 %288 }
  0xb1   : > { %v294_v31 = vpop.permute.xlu0 %293  ;;  %v284_v38 = vpop.permute.xlu1 %283 }
  0xb5   : > { %v436_v53 = vpop.permute.xlu0 %435 }
 0x103   : > { %v404_v24 = vpop.f32.mrf.mxu0  ;;  %v414_v25 = vpop.f32.mrf.mxu1 }
 0x104   : > { %v415_v37 = vadd.f32 %v414_v25, %v294_v31  ;;  %v405_v46 = vadd.f32 %v404_v24, %v284_v38 }
 0x105   : > { %v406_v27 = vpop.f32.mrf.mxu0  ;;  %v416_v28 = vpop.f32.mrf.mxu1 }
 0x106   : > { %v417_v35 = vadd.f32 %v416_v28, %v294_v31  ;;  %v407_v44 = vadd.f32 %v406_v27, %v284_v38  ;;  %v427_v45 = vmax.f32 %v415_v37, 0.0  ;;  %v423_v50 = vmax.f32 %v405_v46, 0.0 }
 0x107   : > { %v408_v29 = vpop.f32.mrf.mxu0  ;;  %v418_v30 = vpop.f32.mrf.mxu1 }
 0x108   : > { %v419_v32 = vadd.f32 %v418_v30, %v299_v23  ;;  %v409_v41 = vadd.f32 %v408_v29, %v289_v26  ;;  %v428_v43 = vmax.f32 %v417_v35, 0.0  ;;  %v424_v49 = vmax.f32 %v407_v44, 0.0 }
 0x109   : > { %v410_v33 = vpop.f32.mrf.mxu0  ;;  %v420_v34 = vpop.f32.mrf.mxu1 }
 0x10a   : > { %v421_v36 = vadd.f32 %v420_v34, %v299_v23  ;;  %v411_v39 = vadd.f32 %v410_v33, %v289_v26  ;;  %v429_v42 = vmax.f32 %v419_v32, 0.0  ;;  %v425_v48 = vmax.f32 %v409_v41, 0.0 }
 0x10c   : > { %v430_v40 = vmax.f32 %v421_v36, 0.0  ;;  %v426_v47 = vmax.f32 %v411_v39, 0.0 }
 0x10e   : > { %466 = vmatprep.subr.mxu1 %v430_v40 }
 0x10f   : > { %467 = vmatpush1.msra.mxu1 %v429_v42 }
 0x110   : > { %468 = vmatprep.subr.mxu1 %v428_v43 }
 0x111   : > { %469 = vmatpush1.msra.mxu1 %v427_v45 }
 0x112   : > { %470 = vmatprep.subr.mxu1 %v426_v47 }
 0x113   : > { %471 = vmatpush1.msra.mxu1 %v425_v48 }
 0x114   : > { %472 = vmatprep.subr.mxu1 %v424_v49 }
 0x115   : > { %473 = vmatpush1.msra.mxu1 %v423_v50 }
 0x116   : > { %642 = vmatmul.mubr.msk.f32.vlgmr.msra.gmra.mxu1 %vm438_vm2, %v431_v51 }
 0x1d6   : > { %v508_v54 = vpop.f32.mrf.mxu1 }
 0x1d7   : > { %v509_v55 = vadd.f32 %v508_v54, %v436_v53 }
 0x1d8   : > { %v510_v57 = vpop.f32.mrf.mxu1 }
 0x1d9   : > { %v515_v58 = vadd.f32 %v513_v52, %v509_v55  ;;  %v511_v59 = vadd.f32 %v510_v57, %v436_v53 }
 0x1db   : > { %517 = vst [vmem:[%s260_s24] sm:$0xff] %v515_v58  ;;  %v516_v60 = vadd.f32 %v514_v56, %v511_v59 }
 0x1dd   : > { %518 = vst [vmem:[%s260_s24 + $0x8] sm:$0xff] %v516_v60 }
 0x1de   : > { %786 = shalt.err (!%p783_p6)
}
 0x1df   : > { %s787_s30 = scalar_lea.hbm %s534_s29, 256  ;;  %s791_s12 = scalar_lea.hbm %s1070_s5, 512 }
 0x1e0   : > { %p788_p4 = scmp.ne.s32.totalorder %s534_s29, %s787_s30  ;;  %p792_p13 = scmp.lt.s32.totalorder %s534_s29, %s1070_s5 }
 0x1e1   : > { %p793_p2 = scmp.lt.s32.totalorder %s791_s12, %s787_s30 }
 0x1e2   : > { %p789_p7 = pnand %p788_p4, %p942_p9 }
 0x1e3   : > { %p794_p8 = por %p793_p2, %p792_p13 }
 0x1e4   : > { %p790_p10 = pneg %p789_p7 }
 0x1e6   : > { %p795_p12 = pnand %p794_p8, %p790_p10 }
 0x1e8   : > { %798 = shalt.err (!%p795_p12)
}
 0x1e9   : > { %664 = dma.vmem_to_hbm [thread:$0]  (%p942_p9), %s537_s25, 256, %s534_s29, %s520_s10  }
 0x1ea PF: > { %s548_s24 = sand.u32 1, %s833_s18   ;;  %p1076_p0 = scmp.ge.s32.totalorder %s853_s23, 2 }
 0x1eb   : > { %s549_s27 = scalar_lea.sflag [#allocation4], %s548_s24 }
 0x1ec   : > { %p671_p1 = pnand %p1076_p0, %p949_p11 }
 0x1ee   : > { %p672_p3 = pneg %p671_p1 }
 0x1f0   : > { %828 = dma.done.wait (%p672_p3), %s549_s27, 256  }
 0x1f1   : > { %830 = vsyncadd (%p672_p3), %s549_s27, 4294967040  ;;  %s21_s23 = sadd.s32 1, %s853_s23   ;;  %s1077_s18 = smov %s837_s19 }
 0x1f2   : > { %p18_p5 = scmp.ge.s32.totalorder %s21_s23, 4   ;;  %s1078_s19 = smov %s841_s20 }
 0x1f3   : > { %s1079_s20 = smov %s947_s7  ;;  %s1080_s21 = smov %s849_s22 }
 0x1f4   : > { %s1081_s22 = smov %s1083_s26  ;;  %20 = sbr.rel (!%p18_p5) target bundleno = 6 (0x6), region = 85 }
 0x1f9   :  { %554 = vsyncpa [#allocation3], 1 }
 0x1fa   :  { %556 = vsyncpa [#allocation3 + $0x1], 1 }
 0x1fb   :  { %557 = vsyncpa [#allocation4], 1 }
 0x1fc   :  { %559 = vsyncpa [#allocation4 + $0x1], 1 }

</bundles_post_ra>
